<compile_context>
chip_gen: v6e
topology: v6e:2x2x1
jax: 0.10.0
libtpu: 0.0.40
codegen_flags: <defaults>
</compile_context>

<pallas_src>
import functools

import numpy as np
import jax
import jax.numpy as jnp
from jax.experimental import pallas as pl
from jax.experimental.pallas import tpu as pltpu


# ----------------------------------------------------------------------------
# Parameter-free setup: precomputed DFT matrices (plain numpy -> constants).
# ----------------------------------------------------------------------------
def _corner_mask(fh, fw):
    """Imag-part mask implementing _treat_corner_cases on the cropped spectrum."""
    m = np.ones((fh, fw), dtype=np.float32)
    m[fh // 2, fw // 2] = 0.0
    if fh % 2 == 0:
        m[0, fw // 2] = 0.0
    if fw % 2 == 0:
        m[fh // 2, 0] = 0.0
    if fh % 2 == 0 and fw % 2 == 0:
        m[0, 0] = 0.0
    return m


def _make_mats(h, w, fh, fw):
    """Packed / block-structured real transform matrices (float32 numpy).

    Forward (fftshift + crop folded in):   Y = A X B^T
    Inverse at the cropped size:           Z = G Y H^T
    """
    n = np.arange(h)
    ki = np.arange(fh) - fh // 2
    A = np.exp(-2j * np.pi * np.outer(ki, n) / h)          # (fh, h)
    m_ = np.arange(w)
    lj = np.arange(fw) - fw // 2
    B = np.exp(-2j * np.pi * np.outer(lj, m_) / w)         # (fw, w)
    ni = np.arange(fh)
    G = np.exp(2j * np.pi * np.outer(ni, ni) / fh) / fh    # (fh, fh)
    Hm = np.exp(2j * np.pi * np.outer(np.arange(fw), np.arange(fw)) / fw) / fw

    f32 = np.float32
    Ar, Ai = A.real.astype(f32), A.imag.astype(f32)
    Br, Bi = B.real.astype(f32), B.imag.astype(f32)
    Gr, Gi = G.real.astype(f32), G.imag.astype(f32)
    Hr, Hi = Hm.real.astype(f32), Hm.imag.astype(f32)

    # Stage 1 (X real):  X @ bpack = [Re(X B^T) | Im(X B^T)]
    bpack = np.ascontiguousarray(np.concatenate([Br.T, Bi.T], axis=1))       # (w, 2fw)
    # Stage 2 (block-structured, applied to Re(U^T)/Im(U^T) separately):
    a1 = np.ascontiguousarray(np.concatenate([Ar.T, Ai.T], axis=1))          # (h, 2fh)
    a2 = np.ascontiguousarray(np.concatenate([-Ai.T, Ar.T], axis=1))         # (h, 2fh)
    # Stage 3 (single matmul on packed [Re(Y^T)|Im(Y^T)]):
    gcomb = np.ascontiguousarray(np.block([[Gr.T, Gi.T], [-Gi.T, Gr.T]]))    # (2fh, 2fh)
    # Stage 4 (block-structured, applied to Re(GY)/Im(GY) separately):
    h1 = np.ascontiguousarray(np.concatenate([Hr.T, Hi.T], axis=1))          # (fw, 2fw)
    h2 = np.ascontiguousarray(np.concatenate([-Hi.T, Hr.T], axis=1))         # (fw, 2fw)
    # Corner-case mask in the packed Y^T layout: ones on the real half,
    # mask^T on the imaginary half.
    cmask = _corner_mask(fh, fw)
    mask2 = np.ascontiguousarray(
        np.concatenate([np.ones((fw, fh), f32), cmask.T.astype(f32)], axis=1))  # (fw, 2fh)
    return bpack, a1, a2, mask2, gcomb, h1, h2


def _vmem_params():
    """Generation-aware (live-set budget, vmem_limit_bytes)."""
    try:
        cap = int(pltpu.get_tpu_info().vmem_capacity_bytes)
    except Exception:
        cap = 64 * 1024 * 1024            # conservative (v7x-like) fallback
    if cap <= 80 * 1024 * 1024:           # v7x: 64 MiB physical per TC
        return 26 * 1024 * 1024, 52 * 1024 * 1024
    return 64 * 1024 * 1024, 100 * 1024 * 1024  # v5e / v6e: 128 MiB physical


def _pick_tb(n, h, w, fh, fw, budget_bytes):
    """Batch-tile size: fill the VMEM budget, keep >=2 grid steps if possible,
    prefer a divisor of n so the wrapper does not have to pad."""
    per_img = (
        4 * 2 * h * w            # double-buffered f32 input block
        + 4 * 2 * fh * fw        # double-buffered f32 output block
        + 2 * h * w              # bf16 cast of the input
        + 4 * h * 2 * fw         # stage-1 f32 result
        + 2 * 4 * h * fw         # bf16 transposed Re/Im operands (stage 2)
        + 4 * fw * 2 * fh * 2    # yt f32 + stage-3 f32 result
        + 2 * fw * 2 * fh        # bf16 masked yt
        + 2 * 4 * fh * fw        # bf16 transposed operands (stage 4)
        + 4 * fh * 2 * fw        # stage-4 f32 result
        + 4 * 3 * fh * fw        # abs / epilogue temporaries
    )
    per_img = int(per_img * 1.25) + 1     # headroom for compiler temporaries
    tb = budget_bytes // per_img
    if n >= 16:                           # >=2 grid steps -> both v7x TCs busy
        tb = min(tb, max(8, (n // 2 // 8) * 8))
    tb = max(8, min(tb, 1024, ((n + 7) // 8) * 8))
    tb = (tb // 8) * 8
    if tb < n and n % tb:                 # prefer a divisor of n (skip padding)
        for cand in range(tb, 7, -8):
            if n % cand == 0:
                tb = cand
                break
    return tb


# ----------------------------------------------------------------------------
# Pallas kernel: TB images of shape (h, w) per grid step.
# ----------------------------------------------------------------------------
def _spectral_pool_kernel(x_ref, bpack_ref, a1_ref, a2_ref, m2_ref,
                          gcomb_ref, h1_ref, h2_ref, o_ref,
                          *, tb, h, w, fh, fw, flat_out):
    bf16 = jnp.bfloat16
    dot = functools.partial(jnp.dot, preferred_element_type=jnp.float32)

    # All matmuls use bf16 operands on the MXU with f32 accumulation;
    # elementwise math (mask, recombination, abs) stays in f32.
    x = x_ref[...].astype(bf16).reshape(tb * h, w)

    # Stage 1:  U = X @ B^T   -> packed [Re(U) | Im(U)] along lanes.
    t1 = dot(x, bpack_ref[...]).reshape(tb, h, 2 * fw)            # (tb, h, 2fw) f32

    # Repack (per-image minor-dim transpose): -> Re(U^T), Im(U^T) of shape (fw, h).
    ur = jnp.swapaxes(t1[:, :, :fw], 1, 2).astype(bf16).reshape(tb * fw, h)
    ui = jnp.swapaxes(t1[:, :, fw:], 1, 2).astype(bf16).reshape(tb * fw, h)

    # Stage 2:  Y^T = U^T @ A^T   (two accumulated large-M matmuls,
    # block-structured constants -> result already packed [Re(Y^T)|Im(Y^T)]).
    yt = dot(ur, a1_ref[...]) + dot(ui, a2_ref[...])              # (tb*fw, 2fh) f32

    # _treat_corner_cases: zero the imaginary part of the DC / Nyquist bins.
    yt = (yt.reshape(tb, fw, 2 * fh) * m2_ref[...]).astype(bf16)

    # Stage 3:  (G Y)^T = Y^T @ G^T   (single matmul on the packed data).
    s3 = dot(yt.reshape(tb * fw, 2 * fh), gcomb_ref[...])
    s3 = s3.reshape(tb, fw, 2 * fh)

    # Repack: -> Re(G Y), Im(G Y) of shape (fh, fw).
    vr = jnp.swapaxes(s3[:, :, :fh], 1, 2).astype(bf16).reshape(tb * fh, fw)
    vi = jnp.swapaxes(s3[:, :, fh:], 1, 2).astype(bf16).reshape(tb * fh, fw)

    # Stage 4:  Z = (G Y) @ H^T   -> packed [Re(Z) | Im(Z)].
    z = dot(vr, h1_ref[...]) + dot(vi, h2_ref[...])               # (tb*fh, 2fw) f32

    # np.abs(ifft2(...)) epilogue (f32).
    zr = z[:, :fw]
    zi = z[:, fw:]
    r = jnp.sqrt(zr * zr + zi * zi)                               # (tb*fh, fw)

    if flat_out:
        # Lane-dense store: build the (tb, fh*fw) slab from safe minor-axis
        # slices + concat (no generic reshape of the minor dims needed).
        r3 = r.reshape(tb, fh, fw)
        o_ref[...] = jnp.concatenate([r3[:, p, :] for p in range(fh)], axis=-1)
    else:
        o_ref[...] = r.reshape(tb, fh, fw)


@functools.partial(jax.jit, static_argnums=(1, 2))
def spectral_pool(x, filter_height, filter_width):
    """Forward pass of SpectralPool.  x: (b, c, h, w) -> (b, c, fh, fw) f32."""
    b, c, h, w = x.shape
    fh, fw = int(filter_height), int(filter_width)
    bpack, a1, a2, mask2, gcomb, h1, h2 = _make_mats(h, w, fh, fw)

    if x.dtype not in (jnp.float32, jnp.bfloat16):
        x = x.astype(jnp.float32)
    n = b * c
    x2 = x.reshape(n, h, w)                     # metadata-only reshape

    budget, vmem_limit = _vmem_params()
    tb = _pick_tb(n, h, w, fh, fw, budget)
    n_pad = pl.cdiv(n, tb) * tb
    if n_pad != n:
        x2 = jnp.pad(x2, ((0, n_pad - n), (0, 0), (0, 0)))

    # Lane-dense flattened output for the common small-filter case.
    flat_out = (fh <= 64) and (fw < 128)

    # bf16 constants for the MXU; mask stays f32 (applied to the f32 accumulator).
    bpack_b = jnp.asarray(bpack, dtype=jnp.bfloat16)
    a1_b = jnp.asarray(a1, dtype=jnp.bfloat16)
    a2_b = jnp.asarray(a2, dtype=jnp.bfloat16)
    gcomb_b = jnp.asarray(gcomb, dtype=jnp.bfloat16)
    h1_b = jnp.asarray(h1, dtype=jnp.bfloat16)
    h2_b = jnp.asarray(h2, dtype=jnp.bfloat16)
    mask2_j = jnp.asarray(mask2, dtype=jnp.float32)

    macs = (h * w * 2 * fw                    # stage 1
            + 2 * (fw * h * 2 * fh)           # stage 2 (two dots)
            + fw * 2 * fh * 2 * fh            # stage 3
            + 2 * (fh * fw * 2 * fw))         # stage 4 (two dots)
    const_bytes = 2 * (bpack.size + a1.size + a2.size + gcomb.size
                       + h1.size + h2.size) + 4 * mask2.size
    cost = pl.CostEstimate(
        flops=int(2 * n_pad * macs),
        transcendentals=0,
        bytes_accessed=int(x2.dtype.itemsize * n_pad * h * w
                           + 4 * n_pad * fh * fw + const_bytes),
    )

    kernel = functools.partial(_spectral_pool_kernel, tb=tb, h=h, w=w,
                               fh=fh, fw=fw, flat_out=flat_out)

    if flat_out:
        out_shape = jax.ShapeDtypeStruct((n_pad, fh * fw), jnp.float32)
        out_spec = pl.BlockSpec((tb, fh * fw), lambda i: (i, 0))
    else:
        out_shape = jax.ShapeDtypeStruct((n_pad, fh, fw), jnp.float32)
        out_spec = pl.BlockSpec((tb, fh, fw), lambda i: (i, 0, 0))

    out = pl.pallas_call(
        kernel,
        out_shape=out_shape,
        grid=(n_pad // tb,),
        in_specs=[
            pl.BlockSpec((tb, h, w), lambda i: (i, 0, 0)),
            pl.BlockSpec(bpack.shape, lambda i: (0, 0)),   # constants: fetched once
            pl.BlockSpec(a1.shape, lambda i: (0, 0)),
            pl.BlockSpec(a2.shape, lambda i: (0, 0)),
            pl.BlockSpec(mask2.shape, lambda i: (0, 0)),
            pl.BlockSpec(gcomb.shape, lambda i: (0, 0)),
            pl.BlockSpec(h1.shape, lambda i: (0, 0)),
            pl.BlockSpec(h2.shape, lambda i: (0, 0)),
        ],
        out_specs=out_spec,
        compiler_params=pltpu.CompilerParams(
            dimension_semantics=("parallel",),
            vmem_limit_bytes=int(vmem_limit)),
        cost_estimate=cost,
    )(x2, bpack_b, a1_b, a2_b, mask2_j, gcomb_b, h1_b, h2_b)

    return out[:n].reshape(b, c, fh, fw)


class SpectralPool:
    """Thin wrapper mirroring the nn.Module interface (forward only)."""

    def __init__(self, filter_height, filter_width):
        self.filter_height = filter_height
        self.filter_width = filter_width

    def __call__(self, x):
        return spectral_pool(x, self.filter_height, self.filter_width)


# ----------------------------------------------------------------------------
# Pure-JAX reference (same semantics, using jnp.fft) for a sanity check.
# ----------------------------------------------------------------------------
def _reference(x, fh, fw):
    h, w = x.shape[-2], x.shape[-1]
    y = jnp.fft.fft2(x.astype(jnp.float32))
    y = jnp.fft.fftshift(y, axes=(-2, -1))
    sh, sw = h // 2 - fh // 2, w // 2 - fw // 2
    y = y[..., sh:sh + fh, sw:sw + fw]
    mask = jnp.asarray(_corner_mask(fh, fw))
    y = y.real + 1j * (y.imag * mask)
    return jnp.abs(jnp.fft.ifft2(y)).astype(jnp.float32)


if __name__ == "__main__":
    key = jax.random.PRNGKey(0)
    x = jax.random.normal(key, (2, 4, 16, 16), dtype=jnp.float32)

    layer = SpectralPool(filter_height=8, filter_width=8)
    out = jax.block_until_ready(layer(x))

    assert out.shape == (2, 4, 8, 8), out.shape
    ref = _reference(x, 8, 8)
    # bf16 MXU operands with f32 accumulation: ~0.3-0.5% typical error.
    np.testing.assert_allclose(np.asarray(out), np.asarray(ref),
                               rtol=2e-2, atol=2e-2)
    print("KERNEL_OK")
</pallas_src>

<mosaic_0001>
module attributes {stable_mosaic.version = 11 : i64} {
  func.func @_spectral_pool_kernel(%arg0: i32, %arg1: memref<8x16x16xf32, #tpu.memory_space<vmem>>, %arg2: memref<16x16xbf16, #tpu.memory_space<vmem>>, %arg3: memref<16x16xbf16, #tpu.memory_space<vmem>>, %arg4: memref<16x16xbf16, #tpu.memory_space<vmem>>, %arg5: memref<8x16xf32, #tpu.memory_space<vmem>>, %arg6: memref<16x16xbf16, #tpu.memory_space<vmem>>, %arg7: memref<8x16xbf16, #tpu.memory_space<vmem>>, %arg8: memref<8x16xbf16, #tpu.memory_space<vmem>>, %arg9: memref<8x64xf32, #tpu.memory_space<vmem>>) attributes {dimension_semantics = [#tpu.dimension_semantics<parallel>], iteration_bounds = array<i64: 1>, scalar_prefetch = 0 : i64, scratch_operands = 0 : i64, tpu.core_type = #tpu.core_type<tc>, window_params = [{transform_indices = @transform_0, window_bounds = array<i64: 8, 16, 16>}, {pipeline_mode = #tpu.pipeline_mode<synchronous>, transform_indices = @transform_1, window_bounds = array<i64: 16, 16>}, {pipeline_mode = #tpu.pipeline_mode<synchronous>, transform_indices = @transform_2, window_bounds = array<i64: 16, 16>}, {pipeline_mode = #tpu.pipeline_mode<synchronous>, transform_indices = @transform_3, window_bounds = array<i64: 16, 16>}, {pipeline_mode = #tpu.pipeline_mode<synchronous>, transform_indices = @transform_4, window_bounds = array<i64: 8, 16>}, {pipeline_mode = #tpu.pipeline_mode<synchronous>, transform_indices = @transform_5, window_bounds = array<i64: 16, 16>}, {pipeline_mode = #tpu.pipeline_mode<synchronous>, transform_indices = @transform_6, window_bounds = array<i64: 8, 16>}, {pipeline_mode = #tpu.pipeline_mode<synchronous>, transform_indices = @transform_7, window_bounds = array<i64: 8, 16>}, {transform_indices = @transform_8, window_bounds = array<i64: 8, 64>}]} {
    %c0 = arith.constant 0 : index
    %c0_0 = arith.constant 0 : index
    %c0_1 = arith.constant 0 : index
    %0 = vector.load %arg1[%c0, %c0_0, %c0_1] : memref<8x16x16xf32, #tpu.memory_space<vmem>>, vector<8x16x16xf32>
    %1 = arith.truncf %0 : vector<8x16x16xf32> to vector<8x16x16xbf16>
    %2 = vector.shape_cast %1 : vector<8x16x16xbf16> to vector<128x16xbf16>
    %c0_2 = arith.constant 0 : index
    %c0_3 = arith.constant 0 : index
    %3 = vector.load %arg2[%c0_2, %c0_3] : memref<16x16xbf16, #tpu.memory_space<vmem>>, vector<16x16xbf16>
    %cst = arith.constant dense<0.000000e+00> : vector<128x16xf32>
    %4 = tpu.matmul %2, %3, %cst {dimension_numbers = #tpu.dot_dimension_numbers<[1], [0], [0], [1], [0, 0, 1, 1], [], []>} : vector<128x16xbf16>, vector<16x16xbf16>, vector<128x16xf32> -> vector<128x16xf32>
    %5 = vector.shape_cast %4 : vector<128x16xf32> to vector<8x16x16xf32>
    %6 = vector.extract_strided_slice %5 {offsets = [0, 0, 0], sizes = [8, 16, 8], strides = [1, 1, 1]} : vector<8x16x16xf32> to vector<8x16x8xf32>
    %7 = tpu.transpose %6, [0, 2, 1] : vector<8x16x8xf32> -> vector<8x8x16xf32>
    %8 = arith.truncf %7 : vector<8x8x16xf32> to vector<8x8x16xbf16>
    %9 = vector.shape_cast %8 : vector<8x8x16xbf16> to vector<64x16xbf16>
    %10 = vector.extract_strided_slice %5 {offsets = [0, 0, 8], sizes = [8, 16, 8], strides = [1, 1, 1]} : vector<8x16x16xf32> to vector<8x16x8xf32>
    %11 = tpu.transpose %10, [0, 2, 1] : vector<8x16x8xf32> -> vector<8x8x16xf32>
    %12 = arith.truncf %11 : vector<8x8x16xf32> to vector<8x8x16xbf16>
    %13 = vector.shape_cast %12 : vector<8x8x16xbf16> to vector<64x16xbf16>
    %c0_4 = arith.constant 0 : index
    %c0_5 = arith.constant 0 : index
    %14 = vector.load %arg3[%c0_4, %c0_5] : memref<16x16xbf16, #tpu.memory_space<vmem>>, vector<16x16xbf16>
    %cst_6 = arith.constant dense<0.000000e+00> : vector<64x16xf32>
    %15 = tpu.matmul %9, %14, %cst_6 {dimension_numbers = #tpu.dot_dimension_numbers<[1], [0], [0], [1], [0, 0, 1, 1], [], []>} : vector<64x16xbf16>, vector<16x16xbf16>, vector<64x16xf32> -> vector<64x16xf32>
    %c0_7 = arith.constant 0 : index
    %c0_8 = arith.constant 0 : index
    %16 = vector.load %arg4[%c0_7, %c0_8] : memref<16x16xbf16, #tpu.memory_space<vmem>>, vector<16x16xbf16>
    %cst_9 = arith.constant dense<0.000000e+00> : vector<64x16xf32>
    %17 = tpu.matmul %13, %16, %cst_9 {dimension_numbers = #tpu.dot_dimension_numbers<[1], [0], [0], [1], [0, 0, 1, 1], [], []>} : vector<64x16xbf16>, vector<16x16xbf16>, vector<64x16xf32> -> vector<64x16xf32>
    %18 = arith.addf %15, %17 : vector<64x16xf32>
    %19 = vector.shape_cast %18 : vector<64x16xf32> to vector<8x8x16xf32>
    %c0_10 = arith.constant 0 : index
    %c0_11 = arith.constant 0 : index
    %20 = vector.load %arg5[%c0_10, %c0_11] : memref<8x16xf32, #tpu.memory_space<vmem>>, vector<8x16xf32>
    %21 = vector.shape_cast %20 : vector<8x16xf32> to vector<1x8x16xf32>
    %22 = vector.broadcast %21 : vector<1x8x16xf32> to vector<8x8x16xf32>
    %23 = arith.mulf %19, %22 : vector<8x8x16xf32>
    %24 = arith.truncf %23 : vector<8x8x16xf32> to vector<8x8x16xbf16>
    %25 = vector.shape_cast %24 : vector<8x8x16xbf16> to vector<64x16xbf16>
    %c0_12 = arith.constant 0 : index
    %c0_13 = arith.constant 0 : index
    %26 = vector.load %arg6[%c0_12, %c0_13] : memref<16x16xbf16, #tpu.memory_space<vmem>>, vector<16x16xbf16>
    %cst_14 = arith.constant dense<0.000000e+00> : vector<64x16xf32>
    %27 = tpu.matmul %25, %26, %cst_14 {dimension_numbers = #tpu.dot_dimension_numbers<[1], [0], [0], [1], [0, 0, 1, 1], [], []>} : vector<64x16xbf16>, vector<16x16xbf16>, vector<64x16xf32> -> vector<64x16xf32>
    %28 = vector.shape_cast %27 : vector<64x16xf32> to vector<8x8x16xf32>
    %29 = vector.extract_strided_slice %28 {offsets = [0, 0, 0], sizes = [8, 8, 8], strides = [1, 1, 1]} : vector<8x8x16xf32> to vector<8x8x8xf32>
    %30 = tpu.transpose %29, [0, 2, 1] : vector<8x8x8xf32> -> vector<8x8x8xf32>
    %31 = arith.truncf %30 : vector<8x8x8xf32> to vector<8x8x8xbf16>
    %32 = vector.shape_cast %31 : vector<8x8x8xbf16> to vector<64x8xbf16>
    %33 = vector.extract_strided_slice %28 {offsets = [0, 0, 8], sizes = [8, 8, 8], strides = [1, 1, 1]} : vector<8x8x16xf32> to vector<8x8x8xf32>
    %34 = tpu.transpose %33, [0, 2, 1] : vector<8x8x8xf32> -> vector<8x8x8xf32>
    %35 = arith.truncf %34 : vector<8x8x8xf32> to vector<8x8x8xbf16>
    %36 = vector.shape_cast %35 : vector<8x8x8xbf16> to vector<64x8xbf16>
    %c0_15 = arith.constant 0 : index
    %c0_16 = arith.constant 0 : index
    %37 = vector.load %arg7[%c0_15, %c0_16] : memref<8x16xbf16, #tpu.memory_space<vmem>>, vector<8x16xbf16>
    %cst_17 = arith.constant dense<0.000000e+00> : vector<64x16xf32>
    %38 = tpu.matmul %32, %37, %cst_17 {dimension_numbers = #tpu.dot_dimension_numbers<[1], [0], [0], [1], [0, 0, 1, 1], [], []>} : vector<64x8xbf16>, vector<8x16xbf16>, vector<64x16xf32> -> vector<64x16xf32>
    %c0_18 = arith.constant 0 : index
    %c0_19 = arith.constant 0 : index
    %39 = vector.load %arg8[%c0_18, %c0_19] : memref<8x16xbf16, #tpu.memory_space<vmem>>, vector<8x16xbf16>
    %cst_20 = arith.constant dense<0.000000e+00> : vector<64x16xf32>
    %40 = tpu.matmul %36, %39, %cst_20 {dimension_numbers = #tpu.dot_dimension_numbers<[1], [0], [0], [1], [0, 0, 1, 1], [], []>} : vector<64x8xbf16>, vector<8x16xbf16>, vector<64x16xf32> -> vector<64x16xf32>
    %41 = arith.addf %38, %40 : vector<64x16xf32>
    %42 = vector.extract_strided_slice %41 {offsets = [0, 0], sizes = [64, 8], strides = [1, 1]} : vector<64x16xf32> to vector<64x8xf32>
    %43 = vector.extract_strided_slice %41 {offsets = [0, 8], sizes = [64, 8], strides = [1, 1]} : vector<64x16xf32> to vector<64x8xf32>
    %44 = arith.mulf %42, %42 : vector<64x8xf32>
    %45 = arith.mulf %43, %43 : vector<64x8xf32>
    %46 = arith.addf %44, %45 : vector<64x8xf32>
    %47 = math.sqrt %46 : vector<64x8xf32>
    %48 = vector.shape_cast %47 : vector<64x8xf32> to vector<8x8x8xf32>
    %49 = vector.extract_strided_slice %48 {offsets = [0, 0, 0], sizes = [8, 1, 8], strides = [1, 1, 1]} : vector<8x8x8xf32> to vector<8x1x8xf32>
    %50 = vector.shape_cast %49 : vector<8x1x8xf32> to vector<8x8xf32>
    %51 = vector.extract_strided_slice %48 {offsets = [0, 1, 0], sizes = [8, 1, 8], strides = [1, 1, 1]} : vector<8x8x8xf32> to vector<8x1x8xf32>
    %52 = vector.shape_cast %51 : vector<8x1x8xf32> to vector<8x8xf32>
    %53 = vector.extract_strided_slice %48 {offsets = [0, 2, 0], sizes = [8, 1, 8], strides = [1, 1, 1]} : vector<8x8x8xf32> to vector<8x1x8xf32>
    %54 = vector.shape_cast %53 : vector<8x1x8xf32> to vector<8x8xf32>
    %55 = vector.extract_strided_slice %48 {offsets = [0, 3, 0], sizes = [8, 1, 8], strides = [1, 1, 1]} : vector<8x8x8xf32> to vector<8x1x8xf32>
    %56 = vector.shape_cast %55 : vector<8x1x8xf32> to vector<8x8xf32>
    %57 = vector.extract_strided_slice %48 {offsets = [0, 4, 0], sizes = [8, 1, 8], strides = [1, 1, 1]} : vector<8x8x8xf32> to vector<8x1x8xf32>
    %58 = vector.shape_cast %57 : vector<8x1x8xf32> to vector<8x8xf32>
    %59 = vector.extract_strided_slice %48 {offsets = [0, 5, 0], sizes = [8, 1, 8], strides = [1, 1, 1]} : vector<8x8x8xf32> to vector<8x1x8xf32>
    %60 = vector.shape_cast %59 : vector<8x1x8xf32> to vector<8x8xf32>
    %61 = vector.extract_strided_slice %48 {offsets = [0, 6, 0], sizes = [8, 1, 8], strides = [1, 1, 1]} : vector<8x8x8xf32> to vector<8x1x8xf32>
    %62 = vector.shape_cast %61 : vector<8x1x8xf32> to vector<8x8xf32>
    %63 = vector.extract_strided_slice %48 {offsets = [0, 7, 0], sizes = [8, 1, 8], strides = [1, 1, 1]} : vector<8x8x8xf32> to vector<8x1x8xf32>
    %64 = vector.shape_cast %63 : vector<8x1x8xf32> to vector<8x8xf32>
    %65 = tpu.concatenate %50, %52, %54, %56, %58, %60, %62, %64 in 1 : vector<8x8xf32>, vector<8x8xf32>, vector<8x8xf32>, vector<8x8xf32>, vector<8x8xf32>, vector<8x8xf32>, vector<8x8xf32>, vector<8x8xf32> -> vector<8x64xf32>
    %c0_21 = arith.constant 0 : index
    %c0_22 = arith.constant 0 : index
    %66 = vector.load %arg9[%c0_21, %c0_22] : memref<8x64xf32, #tpu.memory_space<vmem>>, vector<8x64xf32>
    tpu.vector_store %arg9[%c0_21, %c0_22], %65 {strides = array<i32>} : memref<8x64xf32, #tpu.memory_space<vmem>>, vector<8x64xf32>,
    return
  }
  func.func @transform_0(%arg0: i32) -> (i32, i32, i32) {
    %c0_i32 = arith.constant 0 : i32
    %c0_i32_0 = arith.constant 0 : i32
    %c0_i32_1 = arith.constant 0 : i32
    return %arg0, %c0_i32, %c0_i32_0 : i32, i32, i32
  }
  func.func @transform_1(%arg0: i32) -> (i32, i32) {
    %c0_i32 = arith.constant 0 : i32
    %c0_i32_0 = arith.constant 0 : i32
    %c0_i32_1 = arith.constant 0 : i32
    return %c0_i32, %c0_i32_0 : i32, i32
  }
  func.func @transform_2(%arg0: i32) -> (i32, i32) {
    %c0_i32 = arith.constant 0 : i32
    %c0_i32_0 = arith.constant 0 : i32
    %c0_i32_1 = arith.constant 0 : i32
    return %c0_i32, %c0_i32_0 : i32, i32
  }
  func.func @transform_3(%arg0: i32) -> (i32, i32) {
    %c0_i32 = arith.constant 0 : i32
    %c0_i32_0 = arith.constant 0 : i32
    %c0_i32_1 = arith.constant 0 : i32
    return %c0_i32, %c0_i32_0 : i32, i32
  }
  func.func @transform_4(%arg0: i32) -> (i32, i32) {
    %c0_i32 = arith.constant 0 : i32
    %c0_i32_0 = arith.constant 0 : i32
    %c0_i32_1 = arith.constant 0 : i32
    return %c0_i32, %c0_i32_0 : i32, i32
  }
  func.func @transform_5(%arg0: i32) -> (i32, i32) {
    %c0_i32 = arith.constant 0 : i32
    %c0_i32_0 = arith.constant 0 : i32
    %c0_i32_1 = arith.constant 0 : i32
    return %c0_i32, %c0_i32_0 : i32, i32
  }
  func.func @transform_6(%arg0: i32) -> (i32, i32) {
    %c0_i32 = arith.constant 0 : i32
    %c0_i32_0 = arith.constant 0 : i32
    %c0_i32_1 = arith.constant 0 : i32
    return %c0_i32, %c0_i32_0 : i32, i32
  }
  func.func @transform_7(%arg0: i32) -> (i32, i32) {
    %c0_i32 = arith.constant 0 : i32
    %c0_i32_0 = arith.constant 0 : i32
    %c0_i32_1 = arith.constant 0 : i32
    return %c0_i32, %c0_i32_0 : i32, i32
  }
  func.func @transform_8(%arg0: i32) -> (i32, i32) {
    %c0_i32 = arith.constant 0 : i32
    %c0_i32_0 = arith.constant 0 : i32
    return %arg0, %c0_i32 : i32, i32
  }
}

</mosaic_0001>

<bundles_post_ra>
// kernel: spectral_pool.1
= control target key start
LH: loop header
LB: loop body
LE: loop exit
PB: predicated region body
PF: predicated region fallthrough
CT: control target
= control target key end

     0   :  { %13 = vsyncpa [#allocation3], 0  ;;  %s3140_s0 = inlined_call_operand.hbm [shape: f32[8,16,16], index: 0, kind: input, shape index: {}]   ;;  %s3141_s1 = inlined_call_operand.hbm [shape: bf16[16,16], index: 1, kind: input, shape index: {}, may-alias: {1,2}]   ;;  %s3142_s2 = inlined_call_operand.hbm [shape: bf16[16,16], index: 2, kind: input, shape index: {}, may-alias: {1,2}]   ;;  %s3143_s3 = inlined_call_operand.hbm [shape: bf16[16,16], index: 3, kind: input, shape index: {}]   ;;  %s3144_s4 = inlined_call_operand.vmem [shape: f32[8,16], index: 4, kind: input, shape index: {}]   ;;  %s3145_s5 = inlined_call_operand.hbm [shape: bf16[16,16], index: 5, kind: input, shape index: {}]   ;;  %s3146_s6 = inlined_call_operand.hbm [shape: bf16[8,16], index: 6, kind: input, shape index: {}]   ;;  %s3147_s7 = inlined_call_operand.vmem [shape: bf16[8,16], index: 7, kind: input, shape index: {}]   ;;  %s3148_s8 = inlined_call_operand.vmem [shape: f32[8,64], index: 8, kind: output, shape index: {}]  }
   0x1   :  { %14 = vsyncpa [#allocation5], 0 }
   0x2   :  { %15 = vsyncpa [#allocation8], 0 }
   0x3   :  { %16 = vsyncpa [#allocation11], 0  ;;  %s2759_s27 = smov [#allocation4]  }
   0x4   :  { %s34_s28 = sshll.u32 %s2759_s27, 4  ;;  %s35_s28 = int_to_ptr.vmem [resolvable:$true] %s34_s28 }
   0x5   :  { %s2639_s29 = scalar_lea.vmem %s35_s28, 128  ;;  %p2644_p1 = scmp.lt.s32.totalorder %s35_s28, %s35_s28 }
   0x6   :  { %p2640_p0 = scmp.ne.s32.totalorder %s35_s28, %s2639_s29  ;;  %p2645_p2 = scmp.lt.s32.totalorder %s2639_s29, %s2639_s29 }
   0x8   :  { %p2646_p3 = por %p2645_p2, %p2644_p1 }
   0xa   :  { %p2647_p4 = pnand %p2646_p3, %p2640_p0 }
   0xc   :  { %2650 = shalt.err (!%p2647_p4)
}
   0xd   :  { %s2760_s30 = smov 64   ;;  %s2761_s9 = smov 4  }
   0xe   :  { %40 = dma.hbm_to_vmem [thread:$0]  %s3141_s1, 128, %s35_s28, [#allocation5], %s2760_s30, %s2760_s30, %s2761_s9  }
   0xf   :  { %s2762_s12 = smov [#allocation7]   ;;  %s2763_s14 = smov [#allocation2]  }
  0x10   :  { %s58_s13 = sshll.u32 %s2762_s12, 4  ;;  %s22_s15 = sshll.u32 %s2763_s14, 4  ;;  %s59_s13 = int_to_ptr.vmem [resolvable:$true] %s58_s13  ;;  %s23_s15 = int_to_ptr.vmem [resolvable:$true] %s22_s15 }
  0x11   :  { %s2659_s16 = scalar_lea.vmem %s59_s13, 128  ;;  %p2664_p6 = scmp.lt.s32.totalorder %s59_s13, %s59_s13 }
  0x12   :  { %p2660_p5 = scmp.ne.s32.totalorder %s59_s13, %s2659_s16  ;;  %p2665_p7 = scmp.lt.s32.totalorder %s2659_s16, %s2659_s16 }
  0x14   :  { %p2666_p8 = por %p2665_p7, %p2664_p6 }
  0x16   :  { %p2667_p9 = pnand %p2666_p8, %p2660_p5 }
  0x18   :  { %2670 = shalt.err (!%p2667_p9)
}
  0x19   :  { %64 = dma.hbm_to_vmem [thread:$0]  %s3143_s3, 128, %s59_s13, [#allocation8], %s2760_s30, %s2760_s30, %s2761_s9  }
  0x1a   :  { %s2679_s1 = scalar_lea.vmem %s23_s15, 2048  ;;  %p2684_p11 = scmp.lt.s32.totalorder %s23_s15, %s23_s15 }
  0x1b   :  { %p2680_p10 = scmp.ne.s32.totalorder %s23_s15, %s2679_s1  ;;  %p2685_p12 = scmp.lt.s32.totalorder %s2679_s1, %s2679_s1 }
  0x1d   :  { %p2686_p13 = por %p2685_p12, %p2684_p11 }
  0x1f   :  { %p2687_p0 = pnand %p2686_p13, %p2680_p10 }
  0x21   :  { %2690 = shalt.err (!%p2687_p0)
}
  0x22   :  { %s2764_s19 = smov 128   ;;  %s2765_s20 = smov 8  }
  0x23   :  { %28 = dma.hbm_to_vmem [thread:$0]  %s3140_s0, 2048, %s23_s15, [#allocation3], %s2764_s19, %s2764_s19, %s2765_s20  }
  0x24   :  { %s2766_s23 = smov [#allocation6]   ;;  %s2767_s25 = smov [#allocation9]  }
  0x25   :  { %s46_s24 = sshll.u32 %s2766_s23, 4  ;;  %s72_s3 = sshll.u32 %s2767_s25, 4  ;;  %s47_s24 = int_to_ptr.vmem [resolvable:$true] %s46_s24  ;;  %s73_s3 = int_to_ptr.vmem [resolvable:$true] %s72_s3 }
  0x26   :  { %s2699_s26 = scalar_lea.vmem %s47_s24, 128  ;;  %p2704_p2 = scmp.lt.s32.totalorder %s47_s24, %s47_s24 }
  0x27   :  { %p2700_p1 = scmp.ne.s32.totalorder %s47_s24, %s2699_s26  ;;  %p2705_p3 = scmp.lt.s32.totalorder %s2699_s26, %s2699_s26 }
  0x29   :  { %p2706_p4 = por %p2705_p3, %p2704_p2 }
  0x2b   :  { %p2707_p5 = pnand %p2706_p4, %p2700_p1 }
  0x2d   :  { %2710 = shalt.err (!%p2707_p5)
}
  0x2e   :  { %52 = dma.hbm_to_vmem [thread:$0]  %s3142_s2, 128, %s47_s24, [#allocation5], %s2760_s30, %s2760_s30, %s2761_s9  }
  0x2f   :  { %s2719_s0 = scalar_lea.vmem %s73_s3, 128  ;;  %p2724_p7 = scmp.lt.s32.totalorder %s73_s3, %s73_s3 }
  0x30   :  { %p2720_p6 = scmp.ne.s32.totalorder %s73_s3, %s2719_s0  ;;  %p2725_p8 = scmp.lt.s32.totalorder %s2719_s0, %s2719_s0 }
  0x32   :  { %p2726_p9 = por %p2725_p8, %p2724_p7 }
  0x34   :  { %p2727_p10 = pnand %p2726_p9, %p2720_p6 }
  0x36   :  { %2730 = shalt.err (!%p2727_p10)
}
  0x37   :  { %78 = dma.hbm_to_vmem [thread:$0]  %s3145_s5, 128, %s73_s3, [#allocation8], %s2760_s30, %s2760_s30, %s2761_s9  }
  0x38   :  { %s2768_s11 = smov [#allocation10]  }
  0x39   :  { %s85_s12 = sshll.u32 %s2768_s11, 4  ;;  %s86_s12 = int_to_ptr.vmem [resolvable:$true] %s85_s12 }
  0x3a   :  { %s2739_s13 = scalar_lea.vmem %s86_s12, 64  ;;  %p2744_p12 = scmp.lt.s32.totalorder %s86_s12, %s86_s12 }
  0x3b   :  { %p2740_p11 = scmp.ne.s32.totalorder %s86_s12, %s2739_s13  ;;  %p2745_p13 = scmp.lt.s32.totalorder %s2739_s13, %s2739_s13 }
  0x3d   :  { %p2746_p0 = por %p2745_p13, %p2744_p12 }
  0x3f   :  { %p2747_p1 = pnand %p2746_p0, %p2740_p11 }
  0x41   :  { %2750 = shalt.err (!%p2747_p1)
}
  0x42   :  { %88 = dma.hbm_to_vmem [thread:$0]  %s3146_s6, 64, %s86_s12, [#allocation11]  }
  0x43   :  { %2751 = dma.done.wait [#allocation3], 2048  }
  0x44   :  { %2752 = vsyncadd [#allocation3], 4294965248 }
  0x45   :  { %2753 = dma.done.wait [#allocation5], 256  }
  0x46   :  { %2754 = vsyncadd [#allocation5], 4294967040 }
  0x47   :  { %2755 = dma.done.wait [#allocation8], 256  }
  0x48   :  { %2756 = vsyncadd [#allocation8], 4294967040 }
  0x49   :  { %2757 = dma.done.wait [#allocation11], 64  }
  0x4a   :  { %2758 = vsyncadd [#allocation11], 4294967232  ;;  %v2611_v0 = vld [vmem:[#allocation4] sm:$0xff]   ;;  %v111_v2 = vld [vmem:[#allocation2 + $0x8] sm:$0xff]  ;;  %vm142_vm0 = vcmask 130048   ;;  %s2769_s5 = smov 120  }
  0x4b   :  { %v110_v1 = vld [vmem:[#allocation2] sm:$0xff]  ;;  %v112_v3 = vld [vmem:[#allocation2 + $0x10] sm:$0xff]  ;;  %2333 = vmatprep.subr.bf16.mxu0 %v2611_v0  ;;  %v113_v5 = vld [vmem:[#allocation2 + $0x18] sm:$0xff]  ;;  %2401 = vmatprep.subr.bf16.mxu1 %v2611_v0  ;;  %vm1783_vm1 = vcmask 1043456   ;;  %vm1770_vm2 = vcmask 64512   ;;  %vm2065_vm10 = vcmask 1041409  }
  0x4c   :  { %v126_v4 = vpack.c.bf16 %v111_v2, %v110_v1  ;;  %v114_v6 = vld [vmem:[#allocation2 + $0x20] sm:$0xff]  ;;  %v115_v7 = vld [vmem:[#allocation2 + $0x28] sm:$0xff]  ;;  %2334 = vmatpush3.bf16.msra.mxu0 %v2611_v0  ;;  %v127_v8 = vpack.c.bf16 %v113_v5, %v112_v3  ;;  %2402 = vmatpush3.bf16.msra.mxu1 %v2611_v0  ;;  %v116_v10 = vld [vmem:[#allocation2 + $0x30] sm:$0xff]  ;;  %vm2068_vm12 = vcmask 1042434   ;;  %vm2071_vm15 = vcmask 1043459   ;;  %s2771_s15 = smov 16  }
  0x4d   :  { %v128_v9 = vpack.c.bf16 %v115_v7, %v114_v6  ;;  %v117_v11 = vld [vmem:[#allocation2 + $0x38] sm:$0xff]  ;;  %v122_v12 = vld [vmem:[#allocation2 + $0x60] sm:$0xff]  ;;  %v123_v13 = vld [vmem:[#allocation2 + $0x68] sm:$0xff]  ;;  %s2772_s16 = smov 32   ;;  %s2773_s17 = smov 48  }
  0x4e   :  { %2335 = vmatprep.mubr.msk.bf16.mxu0 %vm142_vm0, %v126_v4  ;;  %v124_v14 = vld [vmem:[#allocation2 + $0x70] sm:$0xff]  ;;  %v132_v15 = vpack.c.bf16 %v123_v13, %v122_v12  ;;  %v125_v16 = vld [vmem:[#allocation2 + $0x78] sm:$0xff]  ;;  %v118_v18 = vld [vmem:[#allocation2 + $0x40] sm:$0xff]  ;;  %v129_v20 = vpack.c.bf16 %v117_v11, %v116_v10  ;;  %s2774_s18 = smov 24   ;;  %s2775_s1 = smov 56  }
  0x4f   :  { %2336 = vmatmul.mubr.msk.bf16.vlgmr.msra.gmra.mxu0 %vm142_vm0, %v127_v8  ;;  %v133_v17 = vpack.c.bf16 %v125_v16, %v124_v14  ;;  %v119_v19 = vld [vmem:[#allocation2 + $0x48] sm:$0xff]  ;;  %v120_v22 = vld [vmem:[#allocation2 + $0x50] sm:$0xff]  ;;  %v121_v23 = vld [vmem:[#allocation2 + $0x58] sm:$0xff] }
  0x50   :  { %2339 = vmatprep.mubr.msk.bf16.mxu0 %vm142_vm0, %v128_v9  ;;  %2347 = vmatprep.mubr.msk.bf16.mxu1 %vm142_vm0, %v132_v15  ;;  %v130_v21 = vpack.c.bf16 %v119_v19, %v118_v18  ;;  %v131_v24 = vpack.c.bf16 %v121_v23, %v120_v22  ;;  %v2612_v52 = vld [vmem:[#allocation7] sm:$0xff]   ;;  %v2613_v54 = vld [vmem:[#allocation6] sm:$0xff]  }
  0x51   :  { %2348 = vmatmul.mubr.msk.bf16.vlgmr.msra.gmra.mxu1 %vm142_vm0, %v133_v17  ;;  %2351 = vmatprep.subr.bf16.mxu1 %v2612_v52 }
  0x52   :  { %2352 = vmatpush3.bf16.msra.mxu1 %v2612_v52 }
  0x53   :  { %2361 = vmatprep.subr.bf16.mxu1 %v2613_v54 }
  0x57   :  { %2340 = vmatmul.mubr.msk.bf16.gmra.mxu0 %vm142_vm0, %v129_v20 }
  0x58   :  { %2343 = vmatprep.mubr.msk.bf16.mxu0 %vm142_vm0, %v130_v21 }
  0x5f   :  { %2344 = vmatmul.mubr.msk.bf16.gmra.mxu0 %vm142_vm0, %v131_v24 }
 0x10f   :  { %v2337_v25 = vpop.f32.mrf.mxu0 }
 0x111   :  { %v201_v26 = vpop.f32.mrf.mxu0  ;;  %v2349_v28 = vpop.f32.mrf.mxu1 }
 0x112   :  { %v2423_v27 = vpack.i.bf16 %v2337_v25, %v201_v26 }
 0x113   :  { %v2338_v29 = vpop.f32.mrf.mxu0  ;;  %v249_v30 = vpop.f32.mrf.mxu1 }
 0x114   :  { %2424 = vrot.lane.b32.xlu0 %v2423_v27, %s2769_s5  ;;  %v2526_v32 = vpack.i.bf16 %v2349_v28, %v249_v30 }
 0x115   :  { %v204_v31 = vpop.f32.mrf.mxu0  ;;  %v2350_v39 = vpop.f32.mrf.mxu1 }
 0x116   :  { %v2501_v33 = vpack.i.bf16 %v2338_v29, %v204_v31 }
 0x117   :  { %v2341_v34 = vpop.f32.mrf.mxu0  ;;  %v252_v43 = vpop.f32.mrf.mxu1 }
 0x118   :  { %2434 = vrot.lane.b32.xlu1 %v2501_v33, %s2769_s5  ;;  %v2458_v46 = vpack.i.bf16 %v2350_v39, %v252_v43  ;;  %v1066_v43 = vld [vmem:[%s3144_s4] sm:$0xff] }
 0x119   :  { %v217_v35 = vpop.f32.mrf.mxu0 }
 0x11a   :  { %v2428_v36 = vpack.i.bf16 %v2341_v34, %v217_v35 }
 0x11b   :  { %v2342_v37 = vpop.f32.mrf.mxu0 }
 0x11c   :  { %2429 = vrot.lane.b32.xlu0 %v2428_v36, %s2769_s5 }
 0x11d   :  { %v220_v38 = vpop.f32.mrf.mxu0 }
 0x11e   :  { %v2510_v40 = vpack.i.bf16 %v2342_v37, %v220_v38 }
 0x11f   :  { %v2345_v41 = vpop.f32.mrf.mxu0 }
 0x120   :  { %2439 = vrot.lane.b32.xlu1 %v2510_v40, %s2769_s5 }
 0x121   :  { %v233_v42 = vpop.f32.mrf.mxu0 }
 0x122   :  { %v2448_v44 = vpack.i.bf16 %v2345_v41, %v233_v42 }
 0x123   :  { %v2346_v45 = vpop.f32.mrf.mxu0 }
 0x124   :  { %2449 = vrot.lane.b32.xlu0 %v2448_v44, %s2769_s5  ;;  %2444 = vrot.lane.b32.xlu1 %v2526_v32, %s2769_s5 }
 0x125   :  { %v236_v47 = vpop.f32.mrf.mxu0 }
 0x126   :  { %v2453_v48 = vpack.i.bf16 %v2346_v45, %v236_v47 }
 0x128   :  { %2454 = vrot.lane.b32.xlu0 %v2453_v48, %s2769_s5  ;;  %2459 = vrot.lane.b32.xlu1 %v2458_v46, %s2769_s5 }
 0x186   :  { %v2425_v49 = vpop.permute.xlu0 %2424 }
 0x187   :  { %2464 = vxpose.xlu0.b32.start [1/2] (short) (narrow) %v2425_v49, 8 }
 0x18a   :  { %v2435_v50 = vpop.permute.xlu1 %2434 }
 0x18b   :  { %2466 = vxpose.xlu0.b32.end [2/2] (short) (narrow) %v2435_v50, 8 }
 0x18e   :  { %v2430_v51 = vpop.permute.xlu0 %2429 }
 0x18f   :  { %2473 = vxpose.xlu1.b32.start [1/2] (short) (narrow) %v2430_v51, 8 }
 0x192   :  { %v2440_v53 = vpop.permute.xlu1 %2439 }
 0x193   :  { %2475 = vxpose.xlu1.b32.end [2/2] (short) (narrow) %v2440_v53, 8 }
 0x196   :  { %v2450_v55 = vpop.permute.xlu0 %2449  ;;  %v2445_v56 = vpop.permute.xlu1 %2444 }
 0x197   :  { %2500 = vxpose.xlu1.b32.start [1/2] (short) (narrow) %v2423_v27, 8  ;;  %2482 = vxpose.xlu0.b32.start [1/2] (short) (narrow) %v2450_v55, 8  ;;  %v2614_v27 = vld [vmem:[#allocation9] sm:$0xff]  }
 0x198   :  { %2371 = vmatprep.subr.bf16.mxu0 %v2614_v27 }
 0x199   :  { %2372 = vmatpush3.bf16.msra.mxu0 %v2614_v27 }
 0x19a   :  { %v2455_v57 = vpop.permute.xlu0 %2454  ;;  %v2460_v58 = vpop.permute.xlu1 %2459 }
 0x19b   :  { %2502 = vxpose.xlu1.b32.end [2/2] (short) (narrow) %v2501_v33, 8  ;;  %2484 = vxpose.xlu0.b32.end [2/2] (short) (narrow) %v2455_v57, 8 }
 0x19f   :  { %2518 = vxpose.xlu1.b32.start [1/2] (short) (narrow) %v2448_v44, 8  ;;  %2491 = vxpose.xlu0.b32.start [1/2] (short) (narrow) %v2445_v56, 8 }
 0x1a3   :  { %2520 = vxpose.xlu1.b32.end [2/2] (short) (narrow) %v2453_v48, 8  ;;  %2493 = vxpose.xlu0.b32.end [2/2] (short) (narrow) %v2460_v58, 8 }
 0x1a7   :  { %2509 = vxpose.xlu0.b32.start [1/2] (short) (narrow) %v2428_v36, 8 }
 0x1ab   :  { %2511 = vxpose.xlu0.b32.end [2/2] (short) (narrow) %v2510_v40, 8 }
 0x1af   :  { %2527 = vxpose.xlu0.b32.start [1/2] (short) (narrow) %v2526_v32, 8 }
 0x1b3   :  { %2529 = vxpose.xlu0.b32.end [2/2] (short) (narrow) %v2458_v46, 8 }
 0x203   :  { %v2467_v59 = vpop.trf.xlu0 }
 0x204   :  { %v2471_v60 = vunpack.i.h.bf16 %v2467_v59  ;;  %v2468_v61 = vunpack.i.l.bf16 %v2467_v59 }
 0x206   :  { %v2279_v62 = vpack.c.bf16 %v2471_v60, %v2468_v61 }
 0x208   :  { %2353 = vmatprep.mubr.msk.bf16.mxu1 %vm142_vm0, %v2279_v62 }
 0x20b   :  { %v2476_v63 = vpop.trf.xlu1 }
 0x20c   :  { %v2480_v0 = vunpack.i.h.bf16 %v2476_v63  ;;  %v2477_v1 = vunpack.i.l.bf16 %v2476_v63 }
 0x20e   :  { %v2280_v2 = vpack.c.bf16 %v2480_v0, %v2477_v1 }
 0x210   :  { %2354 = vmatmul.mubr.msk.bf16.vlgmr.msra.gmra.mxu1 %vm142_vm0, %v2280_v2 }
 0x211   :  { %2362 = vmatpush3.bf16.msra.mxu1 %v2613_v54 }
 0x213   :  { %v2485_v3 = vpop.trf.xlu0  ;;  %v2503_v4 = vpop.trf.xlu1 }
 0x214   :  { %v2489_v5 = vunpack.i.h.bf16 %v2485_v3  ;;  %v2486_v6 = vunpack.i.l.bf16 %v2485_v3  ;;  %v2507_v8 = vunpack.i.h.bf16 %v2503_v4  ;;  %v2504_v9 = vunpack.i.l.bf16 %v2503_v4 }
 0x216   :  { %v2281_v7 = vpack.c.bf16 %v2489_v5, %v2486_v6  ;;  %v2283_v14 = vpack.c.bf16 %v2507_v8, %v2504_v9 }
 0x218   :  { %2357 = vmatprep.mubr.msk.bf16.mxu1 %vm142_vm0, %v2281_v7 }
 0x21b   :  { %v2494_v10 = vpop.trf.xlu0  ;;  %v2521_v11 = vpop.trf.xlu1 }
 0x21c   :  { %v2498_v12 = vunpack.i.h.bf16 %v2494_v10  ;;  %v2495_v13 = vunpack.i.l.bf16 %v2494_v10  ;;  %v2525_v16 = vunpack.i.h.bf16 %v2521_v11  ;;  %v2522_v17 = vunpack.i.l.bf16 %v2521_v11  ;;  %v1749_v10 = vld [vmem:[%s3147_s7] sm:$0xf]  ;;  %s2770_s7 = smov 40  }
 0x21d   :  { %v1748_v11 = vld [vmem:[#allocation10] sm:$0xf]  ;;  %2403 = vmatprep.subr.msk.bf16.mxu1 %vm1783_vm1, %v1749_v10 }
 0x21e   :  { %v2282_v15 = vpack.c.bf16 %v2498_v12, %v2495_v13  ;;  %v2285_v21 = vpack.c.bf16 %v2525_v16, %v2522_v17  ;;  %2404 = vmatprep.subr.msk.bf16.mxu0 %vm1783_vm1, %v1748_v11  ;;  %v1785_v13 = vsel %vm1783_vm1, %v1749_v10, 0 }
 0x220   :  { %2358 = vmatmul.mubr.msk.bf16.gmra.mxu1 %vm142_vm0, %v2282_v15 }
 0x221   :  { %2363 = vmatprep.mubr.msk.bf16.mxu1 %vm142_vm0, %v2283_v14  ;;  %v1885_v14 = vsel %vm1783_vm1, %v1748_v11, 0  ;;  %vm2074_vm1 = vcmask 1044484  }
 0x223   :  { %v2512_v18 = vpop.trf.xlu0 }
 0x224   :  { %v2516_v19 = vunpack.i.h.bf16 %v2512_v18  ;;  %v2513_v20 = vunpack.i.l.bf16 %v2512_v18 }
 0x226   :  { %v2284_v22 = vpack.c.bf16 %v2516_v19, %v2513_v20 }
 0x228   :  { %2364 = vmatmul.mubr.msk.bf16.vlgmr.msra.gmra.mxu1 %vm142_vm0, %v2284_v22 }
 0x229   :  { %2367 = vmatprep.mubr.msk.bf16.mxu1 %vm142_vm0, %v2285_v21  ;;  %2382 = vmatpush3.bf16.msra.mxu1 %v1785_v13 }
 0x22b   :  { %v2530_v23 = vpop.trf.xlu0 }
 0x22c   :  { %v2534_v24 = vunpack.i.h.bf16 %v2530_v23  ;;  %v2531_v25 = vunpack.i.l.bf16 %v2530_v23 }
 0x22e   :  { %v2286_v26 = vpack.c.bf16 %v2534_v24, %v2531_v25 }
 0x230   :  { %2368 = vmatmul.mubr.msk.bf16.gmra.mxu1 %vm142_vm0, %v2286_v26 }
 0x2d0   :  { %v2355_v28 = vpop.f32.mrf.mxu1 }
 0x2d2   :  { %v932_v29 = vpop.f32.mrf.mxu1 }
 0x2d4   :  { %v2356_v30 = vpop.f32.mrf.mxu1 }
 0x2d6   :  { %v935_v31 = vpop.f32.mrf.mxu1 }
 0x2e0   :  { %v2359_v32 = vpop.f32.mrf.mxu1 }
 0x2e2   :  { %v948_v33 = vpop.f32.mrf.mxu1 }
 0x2e4   :  { %v2360_v34 = vpop.f32.mrf.mxu1 }
 0x2e6   :  { %v951_v35 = vpop.f32.mrf.mxu1 }
 0x2e8   :  { %v2365_v36 = vpop.f32.mrf.mxu1 }
 0x2e9   :  { %v1044_v41 = vadd.f32 %v2365_v36, %v2355_v28 }
 0x2ea   :  { %v1035_v37 = vpop.f32.mrf.mxu1 }
 0x2eb   :  { %v1036_v39 = vadd.f32 %v1035_v37, %v932_v29  ;;  %v1069_v49 = vmul.f32 %v1066_v43, %v1044_v41 }
 0x2ec   :  { %v2366_v38 = vpop.f32.mrf.mxu1 }
 0x2ed   :  { %v1047_v40 = vadd.f32 %v2366_v38, %v2356_v30  ;;  %v1067_v47 = vmul.f32 %v1066_v43, %v1036_v39 }
 0x2ee   :  { %v1038_v42 = vpop.f32.mrf.mxu1 }
 0x2ef   :  { %v1039_v44 = vadd.f32 %v1038_v42, %v935_v31  ;;  %v1070_v45 = vmul.f32 %v1066_v43, %v1047_v40 }
 0x2f0   :  { %v2369_v46 = vpop.f32.mrf.mxu1 }
 0x2f1   :  { %v1068_v48 = vmul.f32 %v1066_v43, %v1039_v44  ;;  %v2288_v52 = vpack.c.bf16 %v1070_v45, %v1069_v49  ;;  %v1060_v56 = vadd.f32 %v2369_v46, %v2359_v32 }
 0x2f2   :  { %v1051_v50 = vpop.f32.mrf.mxu1 }
 0x2f3   :  { %v2287_v51 = vpack.c.bf16 %v1068_v48, %v1067_v47  ;;  %v1052_v54 = vadd.f32 %v1051_v50, %v948_v33  ;;  %v1073_v62 = vmul.f32 %v1066_v43, %v1060_v56 }
 0x2f4   :  { %v2370_v53 = vpop.f32.mrf.mxu1 }
 0x2f5   :  { %v1063_v55 = vadd.f32 %v2370_v53, %v2360_v34  ;;  %2373 = vmatprep.mubr.msk.bf16.mxu0 %vm142_vm0, %v2287_v51  ;;  %v1071_v60 = vmul.f32 %v1066_v43, %v1052_v54 }
 0x2f6   :  { %v1054_v57 = vpop.f32.mrf.mxu1  ;;  %2374 = vmatmul.mubr.msk.bf16.vlgmr.msra.gmra.mxu0 %vm142_vm0, %v2288_v52 }
 0x2f7   :  { %v1055_v58 = vadd.f32 %v1054_v57, %v951_v35  ;;  %v1074_v59 = vmul.f32 %v1066_v43, %v1063_v55  ;;  %2392 = vmatpush3.bf16.msra.mxu0 %v1885_v14 }
 0x2f9   :  { %v1072_v61 = vmul.f32 %v1066_v43, %v1055_v58  ;;  %v2290_v0 = vpack.c.bf16 %v1074_v59, %v1073_v62 }
 0x2fb   :  { %v2289_v63 = vpack.c.bf16 %v1072_v61, %v1071_v60 }
 0x2fd   :  { %2377 = vmatprep.mubr.msk.bf16.mxu0 %vm142_vm0, %v2289_v63 }
 0x2fe   :  { %2378 = vmatmul.mubr.msk.bf16.gmra.mxu0 %vm142_vm0, %v2290_v0 }
 0x3b6   :  { %v2375_v1 = vpop.f32.mrf.mxu0 }
 0x3b8   :  { %v1157_v2 = vpop.f32.mrf.mxu0 }
 0x3ba   :  { %v2376_v3 = vpop.f32.mrf.mxu0 }
 0x3bb   :  { %v2540_v4 = vpack.i.bf16 %v2376_v3, %v2375_v1 }
 0x3bc   :  { %v1160_v5 = vpop.f32.mrf.mxu0 }
 0x3bd   :  { %v2535_v6 = vpack.i.bf16 %v1160_v5, %v1157_v2  ;;  %2541 = vrot.lane.b32.xlu0 %v2540_v4, %s2769_s5 }
 0x3be   :  { %v2379_v7 = vpop.f32.mrf.mxu0 }
 0x3bf   :  { %2536 = vrot.lane.b32.xlu1 %v2535_v6, %s2769_s5 }
 0x3c0   :  { %v1173_v8 = vpop.f32.mrf.mxu0 }
 0x3c2   :  { %v2380_v9 = vpop.f32.mrf.mxu0 }
 0x3c3   :  { %v2590_v12 = vpack.i.bf16 %v2380_v9, %v2379_v7 }
 0x3c4   :  { %v1176_v15 = vpop.f32.mrf.mxu0 }
 0x3c5   :  { %v2545_v16 = vpack.i.bf16 %v1176_v15, %v1173_v8 }
 0x3c7   :  { %2546 = vrot.lane.b32.xlu1 %v2545_v16, %s2769_s5 }
 0x3cb   :  { %2551 = vrot.lane.b32.xlu1 %v2590_v12, %s2769_s5 }
 0x3f4   :  { %2556 = vxpose.xlu1.b32.start.end [1/1] (short) (narrow) %v2535_v6, 8 }
 0x42f   :  { %v2542_v17 = vpop.permute.xlu0 %2541 }
 0x430   :  { %2577 = vxpose.xlu1.b32.start.end [1/1] (short) (narrow) %v2542_v17, 8 }
 0x431   :  { %v2537_v18 = vpop.permute.xlu1 %2536 }
 0x432   :  { %2563 = vxpose.xlu0.b32.start.end [1/1] (short) (narrow) %v2537_v18, 8 }
 0x436   :  { %2570 = vxpose.xlu0.b32.start.end [1/1] (short) (narrow) %v2540_v4, 8 }
 0x439   :  { %v2547_v19 = vpop.permute.xlu1 %2546 }
 0x43a   :  { %2584 = vxpose.xlu0.b32.start.end [1/1] (short) (narrow) %v2545_v16, 8  ;;  %2598 = vxpose.xlu1.b32.start.end [1/1] (short) (narrow) %v2547_v19, 8 }
 0x43d   :  { %v2552_v20 = vpop.permute.xlu1 %2551 }
 0x43e   :  { %2591 = vxpose.xlu0.b32.start.end [1/1] (short) (narrow) %v2590_v12, 8  ;;  %2605 = vxpose.xlu1.b32.start.end [1/1] (short) (narrow) %v2552_v20, 8 }
 0x470   :  { %v2557_v21 = vpop.trf.xlu1 }
 0x471   :  { %v2561_v22 = vunpack.i.h.bf16 %v2557_v21  ;;  %v2558_v23 = vunpack.i.l.bf16 %v2557_v21 }
 0x473   :  { %v2295_v24 = vpack.c.bf16 %v2561_v22, %v2558_v23 }
 0x475   :  { %2393 = vmatprep.mubr.msk.bf16.mxu0 %vm1770_vm2, %v2295_v24 }
 0x4ac   :  { %v2578_v25 = vpop.trf.xlu1 }
 0x4ad   :  { %v2582_v26 = vunpack.i.h.bf16 %v2578_v25  ;;  %v2579_v27 = vunpack.i.l.bf16 %v2578_v25 }
 0x4ae   :  { %v2564_v28 = vpop.trf.xlu0 }
 0x4af   :  { %v2568_v29 = vunpack.i.h.bf16 %v2564_v28  ;;  %v2565_v30 = vunpack.i.l.bf16 %v2564_v28  ;;  %v2292_v31 = vpack.c.bf16 %v2582_v26, %v2579_v27 }
 0x4b1   :  { %v2291_v32 = vpack.c.bf16 %v2568_v29, %v2565_v30 }
 0x4b2   :  { %v2571_v33 = vpop.trf.xlu0 }
 0x4b3   :  { %v2575_v34 = vunpack.i.h.bf16 %v2571_v33  ;;  %v2572_v35 = vunpack.i.l.bf16 %v2571_v33  ;;  %2383 = vmatprep.mubr.msk.bf16.mxu1 %vm1770_vm2, %v2291_v32 }
 0x4b4   :  { %2384 = vmatmul.mubr.msk.bf16.vlgmr.msra.gmra.mxu1 %vm1770_vm2, %v2292_v31 }
 0x4b5   :  { %v2296_v36 = vpack.c.bf16 %v2575_v34, %v2572_v35 }
 0x4b6   :  { %v2585_v37 = vpop.trf.xlu0  ;;  %v2599_v38 = vpop.trf.xlu1 }
 0x4b7   :  { %v2589_v39 = vunpack.i.h.bf16 %v2585_v37  ;;  %v2586_v40 = vunpack.i.l.bf16 %v2585_v37  ;;  %2394 = vmatmul.mubr.msk.bf16.vlgmr.msra.gmra.mxu0 %vm1770_vm2, %v2296_v36  ;;  %v2603_v41 = vunpack.i.h.bf16 %v2599_v38  ;;  %v2600_v42 = vunpack.i.l.bf16 %v2599_v38 }
 0x4b9   :  { %v2297_v43 = vpack.c.bf16 %v2589_v39, %v2586_v40  ;;  %v2293_v46 = vpack.c.bf16 %v2603_v41, %v2600_v42 }
 0x4ba   :  { %v2592_v44 = vpop.trf.xlu0  ;;  %v2606_v45 = vpop.trf.xlu1 }
 0x4bb   :  { %v2596_v47 = vunpack.i.h.bf16 %v2592_v44  ;;  %v2593_v48 = vunpack.i.l.bf16 %v2592_v44  ;;  %2397 = vmatprep.mubr.msk.bf16.mxu0 %vm1770_vm2, %v2297_v43  ;;  %v2610_v49 = vunpack.i.h.bf16 %v2606_v45  ;;  %v2607_v50 = vunpack.i.l.bf16 %v2606_v45  ;;  %2387 = vmatprep.mubr.msk.bf16.mxu1 %vm1770_vm2, %v2293_v46 }
 0x4bd   :  { %v2298_v51 = vpack.c.bf16 %v2596_v47, %v2593_v48  ;;  %v2294_v52 = vpack.c.bf16 %v2610_v49, %v2607_v50 }
 0x4bf   :  { %2398 = vmatmul.mubr.msk.bf16.gmra.mxu0 %vm1770_vm2, %v2298_v51  ;;  %2388 = vmatmul.mubr.msk.bf16.gmra.mxu1 %vm1770_vm2, %v2294_v52 }
 0x574   :  { %v2385_v53 = vpop.f32.mrf.mxu1 }
 0x576   :  { %v1821_v54 = vpop.f32.mrf.mxu1 }
 0x577   :  { %v2395_v55 = vpop.f32.mrf.mxu0 }
 0x578   :  { %v1930_v56 = vadd.f32 %v2395_v55, %v2385_v53  ;;  %v2386_v57 = vpop.f32.mrf.mxu1 }
 0x579   :  { %v1921_v58 = vpop.f32.mrf.mxu0 }
 0x57a   :  { %v1954_v59 = vmul.f32 %v1930_v56, %v1930_v56  ;;  %v1922_v60 = vadd.f32 %v1921_v58, %v1821_v54  ;;  %v1824_v0 = vpop.f32.mrf.mxu1 }
 0x57b   :  { %v2396_v61 = vpop.f32.mrf.mxu0 }
 0x57c   :  { %v1952_v62 = vmul.f32 %v1922_v60, %v1922_v60  ;;  %v1933_v63 = vadd.f32 %v2396_v61, %v2386_v57  ;;  %1972 = vrot.lane.b32.xlu1 %v1954_v59, %s2769_s5 }
 0x57d   :  { %v1924_v1 = vpop.f32.mrf.mxu0 }
 0x57e   :  { %v1955_v2 = vmul.f32 %v1933_v63, %v1933_v63  ;;  %v1925_v3 = vadd.f32 %v1924_v1, %v1824_v0  ;;  %1968 = vrot.lane.b32.xlu0 %v1952_v62, %s2769_s5 }
 0x57f   :  { %v2399_v4 = vpop.f32.mrf.mxu0  ;;  %v2389_v5 = vpop.f32.mrf.mxu1 }
 0x580   :  { %1974 = vrot.lane.b32.xlu1 %v1955_v2, %s2769_s5  ;;  %v1953_v7 = vmul.f32 %v1925_v3, %v1925_v3  ;;  %v1946_v12 = vadd.f32 %v2399_v4, %v2389_v5 }
 0x581   :  { %v1937_v6 = vpop.f32.mrf.mxu0  ;;  %v1837_v8 = vpop.f32.mrf.mxu1 }
 0x582   :  { %v1938_v9 = vadd.f32 %v1937_v6, %v1837_v8  ;;  %v1958_v17 = vmul.f32 %v1946_v12, %v1946_v12 }
 0x583   :  { %v2400_v10 = vpop.f32.mrf.mxu0  ;;  %v2390_v11 = vpop.f32.mrf.mxu1 }
 0x584   :  { %1970 = vrot.lane.b32.xlu1 %v1953_v7, %s2769_s5  ;;  %v1956_v13 = vmul.f32 %v1938_v9, %v1938_v9  ;;  %v1949_v18 = vadd.f32 %v2400_v10, %v2390_v11 }
 0x585   :  { %v1940_v14 = vpop.f32.mrf.mxu0  ;;  %v1840_v15 = vpop.f32.mrf.mxu1 }
 0x586   :  { %v1941_v16 = vadd.f32 %v1940_v14, %v1840_v15  ;;  %1976 = vrot.lane.b32.xlu0 %v1956_v13, %s2769_s5  ;;  %v1959_v20 = vmul.f32 %v1949_v18, %v1949_v18 }
 0x588   :  { %v1957_v19 = vmul.f32 %v1941_v16, %v1941_v16 }
 0x58a   :  { %1980 = vrot.lane.b32.xlu0 %v1958_v17, %s2769_s5  ;;  %1978 = vrot.lane.b32.xlu1 %v1957_v19, %s2769_s5 }
 0x58e   :  { %1982 = vrot.lane.b32.xlu1 %v1959_v20, %s2769_s5 }
 0x5ee   :  { %v1973_v21 = vpop.permute.xlu1 %1972 }
 0x5ef   :  { %v1994_v22 = vadd.f32 %v1973_v21, %v1954_v59 }
 0x5f0   :  { %v1969_v23 = vpop.permute.xlu0 %1968 }
 0x5f1   :  { %2615 = vrsqrt.f32 %v1994_v22  ;;  %v1992_v24 = vadd.f32 %v1969_v23, %v1952_v62  ;;  %vm2016_vm3 = vcmp.eq.f32.partialorder %v1994_v22, inf  ;;  %vm2018_vm4 = vcmp.eq.f32.partialorder %v1994_v22, 0.0 }
 0x5f2   :  { %v1975_v25 = vpop.permute.xlu1 %1974  ;;  %v2019_v34 = vand.u32 2147483648, %v1994_v22 }
 0x5f3   :  { %v1995_v26 = vadd.f32 %v1975_v25, %v1955_v2  ;;  %2617 = vrsqrt.f32 %v1992_v24  ;;  %vm2002_vm5 = vcmp.eq.f32.partialorder %v1992_v24, inf  ;;  %vm2004_vm6 = vcmp.eq.f32.partialorder %v1992_v24, 0.0 }
 0x5f4   :  { %v2005_v38 = vand.u32 2147483648, %v1992_v24 }
 0x5f5   :  { %2619 = vrsqrt.f32 %v1995_v26  ;;  %vm2023_vm7 = vcmp.eq.f32.partialorder %v1995_v26, inf  ;;  %vm2025_vm8 = vcmp.eq.f32.partialorder %v1995_v26, 0.0  ;;  %v2026_v39 = vand.u32 2147483648, %v1995_v26 }
 0x5f6   :  { %v1971_v27 = vpop.permute.xlu1 %1970 }
 0x5f7   :  { %v2906_v28 = vadd.f32 %v1971_v27, %v1953_v7 }
 0x5f8   :  { %v1977_v29 = vpop.permute.xlu0 %1976 }
 0x5f9   :  { %2621 = vrsqrt.f32 %v2906_v28  ;;  %v2909_v30 = vadd.f32 %v1977_v29, %v1956_v13  ;;  %vm2009_vm9 = vcmp.eq.f32.partialorder %v2906_v28, inf  ;;  %vm2011_vm11 = vcmp.eq.f32.partialorder %v2906_v28, 0.0 }
 0x5fa   :  { %v2012_v42 = vand.u32 2147483648, %v2906_v28 }
 0x5fb   :  { %2623 = vrsqrt.f32 %v2909_v30  ;;  %v2033_v47 = vand.u32 2147483648, %v2909_v30  ;;  %vm2030_vm13 = vcmp.eq.f32.partialorder %v2909_v30, inf  ;;  %vm2032_vm14 = vcmp.eq.f32.partialorder %v2909_v30, 0.0 }
 0x5fc   :  { %v1981_v31 = vpop.permute.xlu0 %1980  ;;  %v1979_v32 = vpop.permute.xlu1 %1978 }
 0x5fd   :  { %v2912_v35 = vadd.f32 %v1981_v31, %v1958_v17  ;;  %v2914_v36 = vadd.f32 %v1979_v32, %v1957_v19 }
 0x5fe   :  { %v2616_v33 = vpop.eup %2615 }
 0x5ff   :  { %v2015_v37 = vmul.f32 %v2616_v33, %v1994_v22  ;;  %2625 = vrsqrt.f32 %v2912_v35  ;;  %v2047_v50 = vand.u32 2147483648, %v2912_v35  ;;  %v2040_v51 = vand.u32 2147483648, %v2914_v36 }
 0x600   :  { %v2618_v40 = vpop.eup %2617  ;;  %2627 = vrsqrt.f32 %v2914_v36  ;;  %v1983_v43 = vpop.permute.xlu1 %1982 }
 0x601   :  { %v2017_v41 = vsel %vm2016_vm3, %v1994_v22, %v2015_v37  ;;  %v2001_v46 = vmul.f32 %v2618_v40, %v1992_v24  ;;  %v2926_v48 = vadd.f32 %v1983_v43, %v1959_v20  ;;  %vm2044_vm3 = vcmp.eq.f32.partialorder %v2912_v35, inf }
 0x602   :  { %v2620_v44 = vpop.eup %2619  ;;  %v2923_v45 = vsel %vm2018_vm4, %v2019_v34, %v2017_v41  ;;  %vm2046_vm4 = vcmp.eq.f32.partialorder %v2912_v35, 0.0 }
 0x603   :  { %v2022_v49 = vmul.f32 %v2620_v44, %v1995_v26  ;;  %v2157_v52 = vrot.slane %v2923_v45, 3  ;;  %v2003_v53 = vsel %vm2002_vm5, %v1992_v24, %v2001_v46  ;;  %2629 = vrsqrt.f32 %v2926_v48 }
 0x604   :  { %v2140_v54 = vrot.slane %v2923_v45, 2  ;;  %v2088_v55 = vrot.slane %v2923_v45, 7  ;;  %v2938_v56 = vsel %vm2004_vm6, %v2005_v38, %v2003_v53  ;;  %v2054_v58 = vand.u32 2147483648, %v2926_v48 }
 0x605   :  { %v2024_v57 = vsel %vm2023_vm7, %v1995_v26, %v2022_v49  ;;  %v2174_v59 = vrot.slane %v2923_v45, 4  ;;  %v2154_v62 = vrot.slane %v2938_v56, 5  ;;  %v2103_v63 = vrot.slane %v2938_v56, 2 }
 0x606   :  { %v2622_v60 = vpop.eup %2621  ;;  %v2944_v61 = vsel %vm2025_vm8, %v2026_v39, %v2024_v57  ;;  %v2137_v0 = vrot.slane %v2938_v56, 4  ;;  %vm2037_vm5 = vcmp.eq.f32.partialorder %v2914_v36, inf  ;;  %vm2077_vm6 = vcmask 1045509  }
 0x607   :  { %v2008_v1 = vmul.f32 %v2622_v60, %v2906_v28  ;;  %v2159_v2 = vrot.slane %v2944_v61, 2  ;;  %v2107_v3 = vrot.slane %v2944_v61, 7  ;;  %v2142_v4 = vrot.slane %v2944_v61, 1 }
 0x608   :  { %v2086_v5 = vrot.slane %v2938_v56, 1  ;;  %v2090_v6 = vrot.slane %v2944_v61, 6  ;;  %v2171_v7 = vrot.slane %v2938_v56, 6  ;;  %v2176_v8 = vrot.slane %v2944_v61, 3  ;;  %v2624_v9 = vpop.eup %2623 }
 0x609   :  { %v2010_v10 = vsel %vm2009_vm9, %v2906_v28, %v2008_v1  ;;  %vm2039_vm7 = vcmp.eq.f32.partialorder %v2914_v36, 0.0  ;;  %vm2080_vm8 = vcmask 1046534   ;;  %v2120_v11 = vrot.slane %v2938_v56, 3 }
 0x60a   :  { %v2123_v12 = vrot.slane %v2923_v45, 1  ;;  %v2188_v13 = vrot.slane %v2938_v56, 7  ;;  %v2969_v14 = vsel %vm2011_vm11, %v2012_v42, %v2010_v10  ;;  %v2029_v15 = vmul.f32 %v2624_v9, %v2909_v30 }
 0x60b   :  { %v2191_v16 = vrot.slane %v2923_v45, 5  ;;  %v2193_v17 = vrot.slane %v2944_v61, 4  ;;  %vm2051_vm9 = vcmp.eq.f32.partialorder %v2926_v48, inf  ;;  %v2155_v18 = vrot.slane %v2969_v14, 4 }
 0x60c   :  { %v2104_v19 = vrot.slane %v2969_v14, 1  ;;  %v2138_v20 = vrot.slane %v2969_v14, 3  ;;  %v2087_v21 = vsel %vm2065_vm10, %v2969_v14, %v2086_v5  ;;  %v2031_v22 = vsel %vm2030_vm13, %v2909_v30, %v2029_v15  ;;  %v2626_v26 = vpop.eup %2625 }
 0x60d   :  { %vm2053_vm11 = vcmp.eq.f32.partialorder %v2926_v48, 0.0  ;;  %v2089_v23 = vsel %vm2068_vm12, %v2088_v55, %v2087_v21  ;;  %v2172_v24 = vrot.slane %v2969_v14, 5  ;;  %v2121_v25 = vrot.slane %v2969_v14, 2  ;;  %v2628_v32 = vpop.eup %2627 }
 0x60e   :  { %v2989_v27 = vsel %vm2032_vm14, %v2033_v47, %v2031_v22  ;;  %v2156_v28 = vsel %vm2065_vm10, %v2155_v18, %v2154_v62  ;;  %v2105_v29 = vsel %vm2065_vm10, %v2104_v19, %v2103_v63  ;;  %v2139_v31 = vsel %vm2065_vm10, %v2138_v20, %v2137_v0 }
 0x60f   :  { %v2043_v33 = vmul.f32 %v2626_v26, %v2912_v35  ;;  %v2158_v34 = vsel %vm2068_vm12, %v2157_v52, %v2156_v28  ;;  %v2161_v37 = vrot.slane %v2989_v27, 1  ;;  %v2106_v38 = vsel %vm2068_vm12, %v2923_v45, %v2105_v29 }
 0x610   :  { %v2036_v30 = vmul.f32 %v2628_v32, %v2914_v36  ;;  %vm2083_vm13 = vcmask 1047559   ;;  %v2160_v39 = vsel %vm2071_vm15, %v2159_v2, %v2158_v34  ;;  %v2108_v40 = vsel %vm2071_vm15, %v2107_v3, %v2106_v38  ;;  %v2630_v47 = vpop.eup %2629 }
 0x611   :  { %v2109_v41 = vrot.slane %v2989_v27, 6  ;;  %v2045_v42 = vsel %vm2044_vm3, %v2912_v35, %v2043_v33  ;;  %v2162_v43 = vsel %vm2074_vm1, %v2161_v37, %v2160_v39  ;;  %v2141_v44 = vsel %vm2068_vm12, %v2140_v54, %v2139_v31 }
 0x612   :  { %v2091_v46 = vsel %vm2071_vm15, %v2090_v6, %v2089_v23  ;;  %v3015_v49 = vsel %vm2046_vm4, %v2047_v50, %v2045_v42  ;;  %v2038_v52 = vsel %vm2037_vm5, %v2914_v36, %v2036_v30  ;;  %v2143_v55 = vsel %vm2071_vm15, %v2142_v4, %v2141_v44 }
 0x613   :  { %v2110_v53 = vsel %vm2074_vm1, %v2109_v41, %v2108_v40  ;;  %v3026_v54 = vsel %vm2039_vm7, %v2040_v51, %v2038_v52  ;;  %v2050_v57 = vmul.f32 %v2630_v47, %v2926_v48  ;;  %v2164_v35 = vrot.slane %v3015_v49, 7 }
 0x614   :  { %v2113_v50 = vrot.slane %v3015_v49, 4  ;;  %v2163_v60 = vsel %vm2077_vm6, %v3026_v54, %v2162_v43  ;;  %v2111_v62 = vrot.slane %v3026_v54, 5  ;;  %v2144_v63 = vsel %vm2074_vm1, %v2989_v27, %v2143_v55 }
 0x615   :  { %v2145_v0 = vrot.slane %v3026_v54, 7  ;;  %v2052_v36 = vsel %vm2051_vm9, %v2926_v48, %v2050_v57  ;;  %v2165_v51 = vsel %vm2080_vm8, %v2164_v35, %v2163_v60  ;;  %v2147_v1 = vrot.slane %v3015_v49, 6 }
 0x616   :  { %v2092_v2 = vrot.slane %v2989_v27, 5  ;;  %v3047_v3 = vsel %vm2053_vm11, %v2054_v58, %v2052_v36  ;;  %v2112_v4 = vsel %vm2077_vm6, %v2111_v62, %v2110_v53  ;;  %v2094_v6 = vrot.slane %v3026_v54, 4 }
 0x617   :  { %v2146_v5 = vsel %vm2077_vm6, %v2145_v0, %v2144_v63  ;;  %v2166_v9 = vrot.slane %v3047_v3, 6  ;;  %v2114_v10 = vsel %vm2080_vm8, %v2113_v50, %v2112_v4  ;;  %v2115_v15 = vrot.slane %v3047_v3, 3 }
 0x618   :  { %v2148_v18 = vsel %vm2080_vm8, %v2147_v1, %v2146_v5  ;;  %v2149_v19 = vrot.slane %v3047_v3, 5  ;;  %v2093_v48 = vsel %vm2074_vm1, %v2092_v2, %v2091_v46  ;;  %v2096_v58 = vrot.slane %v3015_v49, 3 }
 0x619   :  { %v2098_v20 = vrot.slane %v3047_v3, 2  ;;  %v2167_v21 = vsel %vm2083_vm13, %v2166_v9, %v2165_v51  ;;  %v2116_v22 = vsel %vm2083_vm13, %v2115_v15, %v2114_v10  ;;  %v2095_v23 = vsel %vm2077_vm6, %v2094_v6, %v2093_v48 }
 0x61a   :  { %v2173_v26 = vsel %vm2065_vm10, %v2172_v24, %v2171_v7  ;;  %2168 = vrot.lane.b32.xlu0 %v2167_v21, %s2770_s7  ;;  %2117 = vrot.lane.b32.xlu1 %v2116_v22, %s2771_s15  ;;  %v2150_v28 = vsel %vm2083_vm13, %v2149_v19, %v2148_v18  ;;  %v2097_v29 = vsel %vm2080_vm8, %v2096_v58, %v2095_v23  ;;  %v2178_v32 = vrot.slane %v2989_v27, 2 }
 0x61b   :  { %v2175_v31 = vsel %vm2068_vm12, %v2174_v59, %v2173_v26  ;;  %v2099_v33 = vsel %vm2083_vm13, %v2098_v20, %v2097_v29  ;;  %v2180_v24 = vrot.slane %v3026_v54, 1  ;;  %v2183_v34 = vrot.slane %v3047_v3, 7 }
 0x61c   :  { %v2177_v7 = vsel %vm2071_vm15, %v2176_v8, %v2175_v31  ;;  %v2122_v59 = vsel %vm2065_vm10, %v2121_v25, %v2120_v11  ;;  %v2126_v38 = vrot.slane %v2989_v27, 7  ;;  %v2128_v30 = vrot.slane %v3026_v54, 6 }
 0x61d   :  { %v2179_v37 = vsel %vm2074_vm1, %v2178_v32, %v2177_v7  ;;  %v2124_v8 = vsel %vm2068_vm12, %v2123_v12, %v2122_v59  ;;  %v2130_v40 = vrot.slane %v3015_v49, 5  ;;  %v2132_v41 = vrot.slane %v3047_v3, 4 }
 0x61e   :  { %v2181_v39 = vsel %vm2077_vm6, %v2180_v24, %v2179_v37  ;;  %2151 = vrot.lane.b32.xlu1 %v2150_v28, %s2772_s16  ;;  %2100 = vrot.lane.b32.xlu0 %v2099_v33, %s2765_s20  ;;  %v2125_v25 = vsel %vm2071_vm15, %v2944_v61, %v2124_v8  ;;  %v2189_v42 = vrot.slane %v2969_v14, 6  ;;  %v2195_v43 = vrot.slane %v2989_v27, 3 }
 0x61f   :  { %v2182_v11 = vsel %vm2080_vm8, %v3015_v49, %v2181_v39  ;;  %v2127_v44 = vsel %vm2074_vm1, %v2126_v38, %v2125_v25  ;;  %v2197_v46 = vrot.slane %v3026_v54, 2  ;;  %v2199_v47 = vrot.slane %v3015_v49, 1 }
 0x620   :  { %v2184_v12 = vsel %vm2083_vm13, %v2183_v34, %v2182_v11  ;;  %v2129_v52 = vsel %vm2077_vm6, %v2128_v30, %v2127_v44  ;;  %v2190_v53 = vsel %vm2065_vm10, %v2189_v42, %v2188_v13  ;;  %v2064_v55 = vrot.slane %v2969_v14, 7 }
 0x621   :  { %v2067_v57 = vrot.slane %v2923_v45, 6  ;;  %v2131_v35 = vsel %vm2080_vm8, %v2130_v40, %v2129_v52  ;;  %v2192_v50 = vsel %vm2068_vm12, %v2191_v16, %v2190_v53  ;;  %v2070_v60 = vrot.slane %v2944_v61, 5 }
 0x622   :  { %v2073_v62 = vrot.slane %v2989_v27, 4  ;;  %2185 = vrot.lane.b32.xlu1 %v2184_v12, %s2773_s17  ;;  %v2133_v63 = vsel %vm2083_vm13, %v2132_v41, %v2131_v35  ;;  %v2194_v13 = vsel %vm2071_vm15, %v2193_v17, %v2192_v50  ;;  %v2066_v14 = vsel %vm2065_vm10, %v2064_v55, %v2938_v56 }
 0x623   :  { %v2076_v0 = vrot.slane %v3026_v54, 3  ;;  %2134 = vrot.lane.b32.xlu0 %v2133_v63, %s2774_s18  ;;  %v2196_v45 = vsel %vm2074_vm1, %v2195_v43, %v2194_v13  ;;  %v2069_v16 = vsel %vm2068_vm12, %v2067_v57, %v2066_v14  ;;  %v2079_v27 = vrot.slane %v3015_v49, 2 }
 0x624   :  { %v2198_v36 = vsel %vm2077_vm6, %v2197_v46, %v2196_v45  ;;  %v2072_v51 = vsel %vm2071_vm15, %v2070_v60, %v2069_v16  ;;  %v2082_v61 = vrot.slane %v3047_v3, 1  ;;  %vm2207_vm10 = vcmask 195584  }
 0x625   :  { %v2200_v17 = vsel %vm2080_vm8, %v2199_v47, %v2198_v36  ;;  %v2075_v56 = vsel %vm2074_vm1, %v2073_v62, %v2072_v51  ;;  %vm2209_vm12 = vcmask 261120   ;;  %vm2211_vm14 = vcmask 326656  }
 0x626   :  { %v2201_v54 = vsel %vm2083_vm13, %v3047_v3, %v2200_v17  ;;  %v2078_v1 = vsel %vm2077_vm6, %v2076_v0, %v2075_v56  ;;  %vm2213_vm15 = vcmask 392192   ;;  %vm2215_vm1 = vcmask 457728  }
 0x627   :  { %2202 = vrot.lane.b32.xlu0 %v2201_v54, %s2775_s1  ;;  %v2081_v2 = vsel %vm2080_vm8, %v2079_v27, %v2078_v1  ;;  %vm2217_vm3 = vcmask 523264  }
 0x628   :  { %v2084_v49 = vsel %vm2083_vm13, %v2082_v61, %v2081_v2 }
 0x68c   :  { %v2169_v4 = vpop.permute.xlu0 %2168  ;;  %v2118_v5 = vpop.permute.xlu1 %2117 }
 0x690   :  { %v2101_v6 = vpop.permute.xlu0 %2100  ;;  %v2152_v9 = vpop.permute.xlu1 %2151 }
 0x691   :  { %v2205_v10 = vsel %vm1770_vm2, %v2084_v49, %v2101_v6 }
 0x692   :  { %v2206_v18 = vsel %vm142_vm0, %v2205_v10, %v2118_v5 }
 0x694   :  { %v2186_v48 = vpop.permute.xlu1 %2185 }
 0x695   :  { %v2135_v15 = vpop.permute.xlu0 %2134 }
 0x696   :  { %v2208_v3 = vsel %vm2207_vm10, %v2206_v18, %v2135_v15 }
 0x697   :  { %v2210_v19 = vsel %vm2209_vm12, %v2208_v3, %v2152_v9 }
 0x698   :  { %v2212_v58 = vsel %vm2211_vm14, %v2210_v19, %v2169_v4 }
 0x699   :  { %v2203_v20 = vpop.permute.xlu0 %2202  ;;  %v2214_v21 = vsel %vm2213_vm15, %v2212_v58, %v2186_v48 }
 0x69a   :  { %v2216_v22 = vsel %vm2215_vm1, %v2214_v21, %v2203_v20 }
 0x69b   :  { %2218 = vst.msk [vmem:[%s3148_s8] sm:$0xff] %vm2217_vm3, %v2216_v22 }
 0x69c   :  { %2223 = vsyncpa [#allocation3], 1 }
 0x69d   :  { %2224 = vsyncpa [#allocation5], 1 }
 0x69e   :  { %2225 = vsyncpa [#allocation8], 1 }
 0x69f   :  { %2226 = vsyncpa [#allocation11], 1 }

</bundles_post_ra>
